<compile_context>
chip_gen: v5e
topology: v5e:2x2
jax: 0.10.0
libtpu: 0.0.40
codegen_flags: <defaults>
</compile_context>

<pallas_src>
import jax
import jax.numpy as jnp
from jax import lax
from jax.experimental import pallas as pl
from jax.experimental.pallas import tpu as pltpu


def _tokenizer_kernel(x_ref, wpre_ref, bpre_ref, emb_ve_ref, emb_ev_ref,
                      esq_ref, wpost_ref, bpost_ref,
                      z_ref, zq_ref, tok_ref, rec_ref):
    # x_ref:    (Cz, TN)   pixel tile, channels on sublanes, pixels on lanes
    # wpre:     (E, Cz)    pre_quant_conv 1x1 weight (native torch orientation)
    # bpre:     (E, 1)
    # emb_ve:   (V, E)     codebook
    # emb_ev:   (E, V)     codebook, transposed (precomputed in wrapper)
    # esq:      (V, 1)     ||e||^2 per code (precomputed in wrapper)
    # wpost:    (Cd, E)    post_quant_conv 1x1 weight
    # bpost:    (Cd, 1)
    x = x_ref[...].astype(jnp.float32)                       # (Cz, TN)

    # pre_quant_conv (1x1 conv == per-pixel matmul), channels-first
    z = jnp.dot(wpre_ref[...], x,
                preferred_element_type=jnp.float32) + bpre_ref[...]   # (E, TN)

    # VQ distances.  ||z||^2 is constant per pixel column and cannot change the
    # argmin, so it is dropped: dist = ||e||^2 - 2 * e @ z.
    ze = jnp.dot(emb_ve_ref[...], z,
                 preferred_element_type=jnp.float32)          # (V, TN)
    dist = esq_ref[...] - 2.0 * ze                            # (V, TN)

    # argmin over codebook axis (first occurrence on ties, like torch.argmin)
    vocab = dist.shape[0]
    min_d = jnp.min(dist, axis=0, keepdims=True)              # (1, TN)
    idx = lax.broadcasted_iota(jnp.int32, dist.shape, 0)      # (V, TN)
    cand = jnp.where(dist == min_d, idx, vocab)               # (V, TN)
    tokens = jnp.min(cand, axis=0, keepdims=True)             # (1, TN) int32

    # embedding lookup via one-hot matmul on the MXU; reuse `cand` for the mask
    onehot = (cand == tokens).astype(jnp.float32)             # (V, TN)
    z_q = jnp.dot(emb_ev_ref[...], onehot,
                  preferred_element_type=jnp.float32)         # (E, TN)

    # straight-through: decoder_input = z + (z_q - z).detach() == z_q (fwd value)
    dec_in = z_q

    # post_quant_conv (1x1 conv) -> identity decoder output
    rec = jnp.dot(wpost_ref[...], dec_in,
                  preferred_element_type=jnp.float32) + bpost_ref[...]  # (Cd, TN)

    z_ref[...] = z
    zq_ref[...] = z_q
    tok_ref[...] = tokens
    rec_ref[...] = rec


def _pick_tile(hw, max_tile=2048):
    """Largest pixel tile <= max_tile that divides hw (prefer multiples of 128)."""
    if hw <= max_tile:
        return hw
    start = max_tile - (max_tile % 128)
    for t in range(start, 0, -128):
        if hw % t == 0:
            return t
    for t in range(max_tile, 0, -1):
        if hw % t == 0:
            return t
    return hw


def tokenizer_forward(x_nchw, params, *, tile_n=None):
    """x_nchw: (B, Cz, H, W) float32.  Returns (z, z_q, rec) in NCHW + tokens (B, H*W)."""
    wpre, bpre, emb, wpost, bpost = params
    B, Cz, H, W = x_nchw.shape
    V, E = emb.shape
    Cd = wpost.shape[0]
    HW = H * W
    if tile_n is None:
        tile_n = _pick_tile(HW)
    assert HW % tile_n == 0

    # NCHW -> (B, Cz, H*W): a pure reshape, pixels stay on the fast axis.
    x_flat = x_nchw.reshape(B, Cz, HW)

    # Tiny one-time precomputations (hoisted out of the kernel).
    bpre2 = bpre.reshape(E, 1)
    bpost2 = bpost.reshape(Cd, 1)
    emb_ev = emb.T                                   # (E, V)
    e_sq = jnp.sum(emb * emb, axis=1, keepdims=True)  # (V, 1)

    grid = (B, HW // tile_n)
    const = lambda b, i: (0, 0)
    tile_map = lambda b, i: (b, 0, i)

    z_f, zq_f, tok_f, rec_f = pl.pallas_call(
        _tokenizer_kernel,
        out_shape=(
            jax.ShapeDtypeStruct((B, E, HW), jnp.float32),
            jax.ShapeDtypeStruct((B, E, HW), jnp.float32),
            jax.ShapeDtypeStruct((B, 1, HW), jnp.int32),
            jax.ShapeDtypeStruct((B, Cd, HW), jnp.float32),
        ),
        grid_spec=pltpu.PrefetchScalarGridSpec(
            num_scalar_prefetch=0,
            grid=grid,
            in_specs=[
                pl.BlockSpec((None, Cz, tile_n), tile_map),
                pl.BlockSpec((E, Cz), const),
                pl.BlockSpec((E, 1), const),
                pl.BlockSpec((V, E), const),
                pl.BlockSpec((E, V), const),
                pl.BlockSpec((V, 1), const),
                pl.BlockSpec((Cd, E), const),
                pl.BlockSpec((Cd, 1), const),
            ],
            out_specs=[
                pl.BlockSpec((None, E, tile_n), tile_map),
                pl.BlockSpec((None, E, tile_n), tile_map),
                pl.BlockSpec((None, 1, tile_n), tile_map),
                pl.BlockSpec((None, Cd, tile_n), tile_map),
            ],
        ),
        compiler_params=pltpu.CompilerParams(
            dimension_semantics=("parallel", "parallel")),
    )(x_flat, wpre, bpre2, emb, emb_ev, e_sq, wpost, bpost2)

    # (B, C, H*W) -> NCHW: pure reshapes, no transposes.
    z = z_f.reshape(B, E, H, W)
    z_q = zq_f.reshape(B, E, H, W)
    rec = rec_f.reshape(B, Cd, H, W)
    tokens = tok_f.reshape(B, HW)
    return z, z_q, rec, tokens


def make_params(key, z_channels, embed_dim, dec_z_channels, vocab_size):
    k1, k2, k3, k4, k5 = jax.random.split(key, 5)
    # pre_quant_conv: Conv2d(z_channels, embed_dim, 1) -> weight (E, Cz) (native)
    wpre = (jax.random.normal(k1, (embed_dim, z_channels), jnp.float32)
            * (1.0 / jnp.sqrt(z_channels)))
    bpre = jax.random.normal(k2, (embed_dim,), jnp.float32) * 0.01
    # Embedding(vocab, embed), uniform(-1/vocab, 1/vocab)
    emb = jax.random.uniform(k3, (vocab_size, embed_dim), jnp.float32,
                             minval=-1.0 / vocab_size, maxval=1.0 / vocab_size)
    # post_quant_conv: Conv2d(embed_dim, dec_z_channels, 1) -> weight (Cd, E)
    wpost = (jax.random.normal(k4, (dec_z_channels, embed_dim), jnp.float32)
             * (1.0 / jnp.sqrt(embed_dim)))
    bpost = jax.random.normal(k5, (dec_z_channels,), jnp.float32) * 0.01
    return wpre, bpre, emb, wpost, bpost


if __name__ == "__main__":
    B, Cz, H, W = 2, 4, 16, 16        # encoder output (identity encoder) in NCHW
    embed_dim = 32
    vocab_size = 64
    dec_z_channels = 4

    key = jax.random.PRNGKey(0)
    kx, kp = jax.random.split(key)
    x = jax.random.uniform(kx, (B, Cz, H, W), jnp.float32)   # "encoder output"
    params = make_params(kp, Cz, embed_dim, dec_z_channels, vocab_size)

    z, z_q, rec, tokens = tokenizer_forward(x, params)
    jax.block_until_ready((z, z_q, rec, tokens))

    assert z.shape == (B, embed_dim, H, W)
    assert z_q.shape == (B, embed_dim, H, W)
    assert rec.shape == (B, dec_z_channels, H, W)
    assert tokens.shape == (B, H * W)
    assert tokens.dtype == jnp.int32
    print("KERNEL_OK")
</pallas_src>

<mosaic_0001>
module attributes {stable_mosaic.version = 11 : i64} {
  func.func @_tokenizer_kernel(%arg0: i32, %arg1: i32, %arg2: memref<1x4x256xf32, #tpu.memory_space<vmem>>, %arg3: memref<32x4xf32, #tpu.memory_space<vmem>>, %arg4: memref<32x1xf32, #tpu.memory_space<vmem>>, %arg5: memref<64x32xf32, #tpu.memory_space<vmem>>, %arg6: memref<32x64xf32, #tpu.memory_space<vmem>>, %arg7: memref<64x1xf32, #tpu.memory_space<vmem>>, %arg8: memref<4x32xf32, #tpu.memory_space<vmem>>, %arg9: memref<4x1xf32, #tpu.memory_space<vmem>>, %arg10: memref<1x32x256xf32, #tpu.memory_space<vmem>>, %arg11: memref<1x32x256xf32, #tpu.memory_space<vmem>>, %arg12: memref<1x1x256xi32, #tpu.memory_space<vmem>>, %arg13: memref<1x4x256xf32, #tpu.memory_space<vmem>>) attributes {dimension_semantics = [#tpu.dimension_semantics<parallel>, #tpu.dimension_semantics<parallel>], iteration_bounds = array<i64: 2, 1>, scalar_prefetch = 0 : i64, scratch_operands = 0 : i64, tpu.core_type = #tpu.core_type<tc>, window_params = [{transform_indices = @transform_0, window_bounds = array<i64: 1, 4, 256>}, {pipeline_mode = #tpu.pipeline_mode<synchronous>, transform_indices = @transform_1, window_bounds = array<i64: 32, 4>}, {pipeline_mode = #tpu.pipeline_mode<synchronous>, transform_indices = @transform_2, window_bounds = array<i64: 32, 1>}, {pipeline_mode = #tpu.pipeline_mode<synchronous>, transform_indices = @transform_3, window_bounds = array<i64: 64, 32>}, {pipeline_mode = #tpu.pipeline_mode<synchronous>, transform_indices = @transform_4, window_bounds = array<i64: 32, 64>}, {pipeline_mode = #tpu.pipeline_mode<synchronous>, transform_indices = @transform_5, window_bounds = array<i64: 64, 1>}, {pipeline_mode = #tpu.pipeline_mode<synchronous>, transform_indices = @transform_6, window_bounds = array<i64: 4, 32>}, {pipeline_mode = #tpu.pipeline_mode<synchronous>, transform_indices = @transform_7, window_bounds = array<i64: 4, 1>}, {transform_indices = @transform_8, window_bounds = array<i64: 1, 32, 256>}, {transform_indices = @transform_9, window_bounds = array<i64: 1, 32, 256>}, {transform_indices = @transform_10, window_bounds = array<i64: 1, 1, 256>}, {transform_indices = @transform_11, window_bounds = array<i64: 1, 4, 256>}]} {
    %c0 = arith.constant 0 : index
    %c0_0 = arith.constant 0 : index
    %c0_1 = arith.constant 0 : index
    %0 = vector.load %arg2[%c0, %c0_0, %c0_1] : memref<1x4x256xf32, #tpu.memory_space<vmem>>, vector<1x4x256xf32>
    %1 = vector.shape_cast %0 : vector<1x4x256xf32> to vector<4x256xf32>
    %c0_2 = arith.constant 0 : index
    %c0_3 = arith.constant 0 : index
    %2 = vector.load %arg3[%c0_2, %c0_3] : memref<32x4xf32, #tpu.memory_space<vmem>>, vector<32x4xf32>
    %cst = arith.constant dense<0.000000e+00> : vector<32x256xf32>
    %3 = tpu.matmul %2, %1, %cst {dimension_numbers = #tpu.dot_dimension_numbers<[1], [0], [0], [1], [0, 0, 1, 1], [], []>} : vector<32x4xf32>, vector<4x256xf32>, vector<32x256xf32> -> vector<32x256xf32>
    %c0_4 = arith.constant 0 : index
    %c0_5 = arith.constant 0 : index
    %4 = vector.load %arg4[%c0_4, %c0_5] : memref<32x1xf32, #tpu.memory_space<vmem>>, vector<32x1xf32>
    %5 = vector.broadcast %4 : vector<32x1xf32> to vector<32x256xf32>
    %6 = arith.addf %3, %5 : vector<32x256xf32>
    %c0_6 = arith.constant 0 : index
    %c0_7 = arith.constant 0 : index
    %7 = vector.load %arg5[%c0_6, %c0_7] : memref<64x32xf32, #tpu.memory_space<vmem>>, vector<64x32xf32>
    %cst_8 = arith.constant dense<0.000000e+00> : vector<64x256xf32>
    %8 = tpu.matmul %7, %6, %cst_8 {dimension_numbers = #tpu.dot_dimension_numbers<[1], [0], [0], [1], [0, 0, 1, 1], [], []>} : vector<64x32xf32>, vector<32x256xf32>, vector<64x256xf32> -> vector<64x256xf32>
    %c0_9 = arith.constant 0 : index
    %c0_10 = arith.constant 0 : index
    %9 = vector.load %arg7[%c0_9, %c0_10] : memref<64x1xf32, #tpu.memory_space<vmem>>, vector<64x1xf32>
    %cst_11 = arith.constant 2.000000e+00 : f32
    %10 = vector.broadcast %cst_11 : f32 to vector<64x256xf32>
    %11 = arith.mulf %10, %8 : vector<64x256xf32>
    %12 = vector.broadcast %9 : vector<64x1xf32> to vector<64x256xf32>
    %13 = arith.subf %12, %11 : vector<64x256xf32>
    %cst_12 = arith.constant dense<0x7F800000> : vector<256xf32>
    %14 = vector.multi_reduction <minimumf>, %13, %cst_12 [0] : vector<64x256xf32> to vector<256xf32>
    %15 = vector.shape_cast %14 : vector<256xf32> to vector<1x256xf32>
    %16 = tpu.iota {dimensions = array<i32: 0>} : vector<64x256xi32>
    %17 = vector.broadcast %15 : vector<1x256xf32> to vector<64x256xf32>
    %18 = arith.cmpf oeq, %13, %17 : vector<64x256xf32>
    %c64_i32 = arith.constant 64 : i32
    %19 = vector.broadcast %c64_i32 : i32 to vector<64x256xi32>
    %20 = arith.select %18, %16, %19 : vector<64x256xi1>, vector<64x256xi32>
    %cst_13 = arith.constant dense<2147483647> : vector<256xi32>
    %21 = vector.multi_reduction <minsi>, %20, %cst_13 [0] : vector<64x256xi32> to vector<256xi32>
    %22 = vector.shape_cast %21 : vector<256xi32> to vector<1x256xi32>
    %23 = vector.broadcast %22 : vector<1x256xi32> to vector<64x256xi32>
    %24 = arith.cmpi eq, %20, %23 : vector<64x256xi32>
    %25 = arith.extui %24 : vector<64x256xi1> to vector<64x256xi32>
    %26 = arith.sitofp %25 : vector<64x256xi32> to vector<64x256xf32>
    %c0_14 = arith.constant 0 : index
    %c0_15 = arith.constant 0 : index
    %27 = vector.load %arg6[%c0_14, %c0_15] : memref<32x64xf32, #tpu.memory_space<vmem>>, vector<32x64xf32>
    %cst_16 = arith.constant dense<0.000000e+00> : vector<32x256xf32>
    %28 = tpu.matmul %27, %26, %cst_16 {dimension_numbers = #tpu.dot_dimension_numbers<[1], [0], [0], [1], [0, 0, 1, 1], [], []>} : vector<32x64xf32>, vector<64x256xf32>, vector<32x256xf32> -> vector<32x256xf32>
    %c0_17 = arith.constant 0 : index
    %c0_18 = arith.constant 0 : index
    %29 = vector.load %arg8[%c0_17, %c0_18] : memref<4x32xf32, #tpu.memory_space<vmem>>, vector<4x32xf32>
    %cst_19 = arith.constant dense<0.000000e+00> : vector<4x256xf32>
    %30 = tpu.matmul %29, %28, %cst_19 {dimension_numbers = #tpu.dot_dimension_numbers<[1], [0], [0], [1], [0, 0, 1, 1], [], []>} : vector<4x32xf32>, vector<32x256xf32>, vector<4x256xf32> -> vector<4x256xf32>
    %c0_20 = arith.constant 0 : index
    %c0_21 = arith.constant 0 : index
    %31 = vector.load %arg9[%c0_20, %c0_21] : memref<4x1xf32, #tpu.memory_space<vmem>>, vector<4x1xf32>
    %32 = vector.broadcast %31 : vector<4x1xf32> to vector<4x256xf32>
    %33 = arith.addf %30, %32 : vector<4x256xf32>
    %c0_22 = arith.constant 0 : index
    %c0_23 = arith.constant 0 : index
    %c0_24 = arith.constant 0 : index
    %34 = vector.load %arg10[%c0_22, %c0_23, %c0_24] : memref<1x32x256xf32, #tpu.memory_space<vmem>>, vector<1x32x256xf32>
    %35 = vector.shape_cast %34 : vector<1x32x256xf32> to vector<32x256xf32>
    %36 = vector.shape_cast %6 : vector<32x256xf32> to vector<1x32x256xf32>
    tpu.vector_store %arg10[%c0_22, %c0_23, %c0_24], %36 {strides = array<i32>} : memref<1x32x256xf32, #tpu.memory_space<vmem>>, vector<1x32x256xf32>,
    %c0_25 = arith.constant 0 : index
    %c0_26 = arith.constant 0 : index
    %c0_27 = arith.constant 0 : index
    %37 = vector.load %arg11[%c0_25, %c0_26, %c0_27] : memref<1x32x256xf32, #tpu.memory_space<vmem>>, vector<1x32x256xf32>
    %38 = vector.shape_cast %37 : vector<1x32x256xf32> to vector<32x256xf32>
    %39 = vector.shape_cast %28 : vector<32x256xf32> to vector<1x32x256xf32>
    tpu.vector_store %arg11[%c0_25, %c0_26, %c0_27], %39 {strides = array<i32>} : memref<1x32x256xf32, #tpu.memory_space<vmem>>, vector<1x32x256xf32>,
    %c0_28 = arith.constant 0 : index
    %c0_29 = arith.constant 0 : index
    %c0_30 = arith.constant 0 : index
    %40 = vector.load %arg12[%c0_28, %c0_29, %c0_30] : memref<1x1x256xi32, #tpu.memory_space<vmem>>, vector<1x1x256xi32>
    %41 = vector.shape_cast %40 : vector<1x1x256xi32> to vector<1x256xi32>
    %42 = vector.shape_cast %22 : vector<1x256xi32> to vector<1x1x256xi32>
    tpu.vector_store %arg12[%c0_28, %c0_29, %c0_30], %42 {strides = array<i32>} : memref<1x1x256xi32, #tpu.memory_space<vmem>>, vector<1x1x256xi32>,
    %c0_31 = arith.constant 0 : index
    %c0_32 = arith.constant 0 : index
    %c0_33 = arith.constant 0 : index
    %43 = vector.load %arg13[%c0_31, %c0_32, %c0_33] : memref<1x4x256xf32, #tpu.memory_space<vmem>>, vector<1x4x256xf32>
    %44 = vector.shape_cast %43 : vector<1x4x256xf32> to vector<4x256xf32>
    %45 = vector.shape_cast %33 : vector<4x256xf32> to vector<1x4x256xf32>
    tpu.vector_store %arg13[%c0_31, %c0_32, %c0_33], %45 {strides = array<i32>} : memref<1x4x256xf32, #tpu.memory_space<vmem>>, vector<1x4x256xf32>,
    return
  }
  func.func @transform_0(%arg0: i32, %arg1: i32) -> (i32, i32, i32) {
    %c0_i32 = arith.constant 0 : i32
    %c0_i32_0 = arith.constant 0 : i32
    return %arg0, %c0_i32, %arg1 : i32, i32, i32
  }
  func.func @transform_1(%arg0: i32, %arg1: i32) -> (i32, i32) {
    %c0_i32 = arith.constant 0 : i32
    %c0_i32_0 = arith.constant 0 : i32
    %c0_i32_1 = arith.constant 0 : i32
    return %c0_i32, %c0_i32_0 : i32, i32
  }
  func.func @transform_2(%arg0: i32, %arg1: i32) -> (i32, i32) {
    %c0_i32 = arith.constant 0 : i32
    %c0_i32_0 = arith.constant 0 : i32
    %c0_i32_1 = arith.constant 0 : i32
    return %c0_i32, %c0_i32_0 : i32, i32
  }
  func.func @transform_3(%arg0: i32, %arg1: i32) -> (i32, i32) {
    %c0_i32 = arith.constant 0 : i32
    %c0_i32_0 = arith.constant 0 : i32
    %c0_i32_1 = arith.constant 0 : i32
    return %c0_i32, %c0_i32_0 : i32, i32
  }
  func.func @transform_4(%arg0: i32, %arg1: i32) -> (i32, i32) {
    %c0_i32 = arith.constant 0 : i32
    %c0_i32_0 = arith.constant 0 : i32
    %c0_i32_1 = arith.constant 0 : i32
    return %c0_i32, %c0_i32_0 : i32, i32
  }
  func.func @transform_5(%arg0: i32, %arg1: i32) -> (i32, i32) {
    %c0_i32 = arith.constant 0 : i32
    %c0_i32_0 = arith.constant 0 : i32
    %c0_i32_1 = arith.constant 0 : i32
    return %c0_i32, %c0_i32_0 : i32, i32
  }
  func.func @transform_6(%arg0: i32, %arg1: i32) -> (i32, i32) {
    %c0_i32 = arith.constant 0 : i32
    %c0_i32_0 = arith.constant 0 : i32
    %c0_i32_1 = arith.constant 0 : i32
    return %c0_i32, %c0_i32_0 : i32, i32
  }
  func.func @transform_7(%arg0: i32, %arg1: i32) -> (i32, i32) {
    %c0_i32 = arith.constant 0 : i32
    %c0_i32_0 = arith.constant 0 : i32
    %c0_i32_1 = arith.constant 0 : i32
    return %c0_i32, %c0_i32_0 : i32, i32
  }
  func.func @transform_8(%arg0: i32, %arg1: i32) -> (i32, i32, i32) {
    %c0_i32 = arith.constant 0 : i32
    %c0_i32_0 = arith.constant 0 : i32
    return %arg0, %c0_i32, %arg1 : i32, i32, i32
  }
  func.func @transform_9(%arg0: i32, %arg1: i32) -> (i32, i32, i32) {
    %c0_i32 = arith.constant 0 : i32
    %c0_i32_0 = arith.constant 0 : i32
    return %arg0, %c0_i32, %arg1 : i32, i32, i32
  }
  func.func @transform_10(%arg0: i32, %arg1: i32) -> (i32, i32, i32) {
    %c0_i32 = arith.constant 0 : i32
    %c0_i32_0 = arith.constant 0 : i32
    return %arg0, %c0_i32, %arg1 : i32, i32, i32
  }
  func.func @transform_11(%arg0: i32, %arg1: i32) -> (i32, i32, i32) {
    %c0_i32 = arith.constant 0 : i32
    %c0_i32_0 = arith.constant 0 : i32
    return %arg0, %c0_i32, %arg1 : i32, i32, i32
  }
}

</mosaic_0001>

<bundles_post_ra>
// kernel: tpu_custom_call.1
= control target key start
LH: loop header
LB: loop body
LE: loop exit
PB: predicated region body
PF: predicated region fallthrough
CT: control target
= control target key end

     0   :  { %s2176_s0 = inlined_call_operand.vmem [shape: f32[2,4,256], index: 0, kind: input, shape index: {}]   ;;  %s2177_s1 = inlined_call_operand.vmem [shape: f32[32,4], index: 1, kind: input, shape index: {}]   ;;  %s2178_s2 = inlined_call_operand.vmem [shape: f32[32,1], index: 2, kind: input, shape index: {}]   ;;  %s2179_s3 = inlined_call_operand.vmem [shape: f32[64,32], index: 3, kind: input, shape index: {}]   ;;  %s2180_s4 = inlined_call_operand.vmem [shape: f32[32,64], index: 4, kind: input, shape index: {}]   ;;  %s2181_s5 = inlined_call_operand.vmem [shape: f32[64,1], index: 5, kind: input, shape index: {}]   ;;  %s2182_s6 = inlined_call_operand.vmem [shape: f32[4,32], index: 6, kind: input, shape index: {}]   ;;  %s2183_s7 = inlined_call_operand.vmem [shape: f32[4,1], index: 7, kind: input, shape index: {}]   ;;  %s2184_s8 = inlined_call_operand.hbm [shape: f32[2,32,256], index: 8, kind: output, shape index: {0}]   ;;  %s2185_s9 = inlined_call_operand.hbm [shape: f32[2,32,256], index: 9, kind: output, shape index: {1}]   ;;  %s2186_s10 = inlined_call_operand.hbm [shape: s32[2,1,256], index: 10, kind: output, shape index: {2}]   ;;  %s2187_s11 = inlined_call_operand.hbm [shape: f32[2,4,256], index: 11, kind: output, shape index: {3}]  }
   0x1   :  { %2192 = sst [smem:[#allocation15_spill]] %s2176_s0 }
   0x2   :  { %2193 = sst [smem:[#allocation16_spill]] %s2177_s1 }
   0x3   :  { %2194 = sst [smem:[#allocation17_spill]] %s2178_s2 }
   0x4   :  { %2195 = sst [smem:[#allocation18_spill]] %s2179_s3 }
   0x5   :  { %2196 = sst [smem:[#allocation19_spill]] %s2180_s4 }
   0x6   :  { %2197 = sst [smem:[#allocation20_spill]] %s2181_s5 }
   0x7   :  { %2198 = sst [smem:[#allocation21_spill]] %s2182_s6 }
   0x8   :  { %2199 = sst [smem:[#allocation22_spill]] %s2183_s7 }
   0x9   :  { %2200 = sst [smem:[#allocation23_spill]] %s2185_s9 }
   0xa   :  { %17 = vsyncpa [#allocation3], 0 }
   0xb   :  { %19 = vsyncpa [#allocation3 + $0x1], 0 }
   0xc   :  { %20 = vsyncpa [#allocation5], 0 }
   0xd   :  { %22 = vsyncpa [#allocation5 + $0x1], 0 }
   0xe   :  { %23 = vsyncpa [#allocation8], 0 }
   0xf   :  { %25 = vsyncpa [#allocation8 + $0x1], 0  ;;  %s1750_s17 = smov 0   ;;  %s1752_s18 = smov 0  }
  0x10   :  { %s1754_s19 = smov 0   ;;  %s1756_s20 = smov 0  }
  0x11   :  { %s1758_s21 = smov 0   ;;  %s1760_s22 = smov 0  }
  0x12 LB: > { %2201 = sst [smem:[#allocation12_spill]] %s1680_s21  ;;  %s2189_s23 = sadd.s32 4294967295, %s1684_s22   ;;  %s1684_s22 = sphi %s1760_s22, %s31_s22   ;;  %s1680_s21 = sphi %s1758_s21, %s2219_s21   ;;  %s1676_s20 = sphi %s1756_s20, %s2218_s20   ;;  %s1672_s19 = sphi %s1754_s19, %s2222_s19   ;;  %s1668_s18 = sphi %s1752_s18, %s2221_s18   ;;  %s1664_s17 = sphi %s1750_s17, %s2220_s17  }
  0x13   : > { %s2188_s24 = sadd.s32 4294967294, %s1684_s22   ;;  %s43_s25 = sadd.s32 1, %s1680_s21 }
  0x14   : > { %s227_s26 = sadd.s32 1, %s1672_s19  ;;  %p45_p0 = scmp.ge.s32.totalorder %s43_s25, 2 }
  0x15   : > { %p237_p1 = scmp.ne.s32.totalorder %s1672_s19, %s1668_s18  ;;  %p238_p2 = scmp.eq.s32.totalorder %s2189_s23, 1 }
  0x16   : > { %p243_p3 = scmp.ne.s32.totalorder %s1668_s18, %s1664_s17  ;;  %s2224_s25 = smov (%p45_p0, %s43_s25), 0 }
  0x17   : > { %2202 = sst [smem:[#allocation13_spill]] %s2224_s25  ;;  %p1792_p4 = por %p238_p2, %p237_p1 }
  0x18   : > { %p244_p5 = scmp.eq.s32.totalorder %s2188_s24, 1  ;;  %s222_s28 = ssub.s32 %s1680_s21, %s2224_s25 }
  0x19   : > { %p1345_p6 = scmp.ge.s32.totalorder %s1684_s22, 1  ;;  %p225_p7 = scmp.eq.s32.totalorder %s222_s28, 0 }
  0x1a   : > { %p1801_p8 = por %p244_p5, %p243_p3  ;;  %p380_p9 = scmp.lt.s32.totalorder %s1684_s22, 3 }
  0x1b   : > { %s1807_s30 = scalar_select %p225_p7, %s1672_s19, %s227_s26  }
  0x1c   : > { %p381_p10 = pnand %p1345_p6, %p380_p9 }
  0x1d   : > { %2205 = sst [smem:[#allocation14_spill]] %s1807_s30  ;;  %p440_p11 = scmp.lt.s32.totalorder (!%p381_p10), %s1676_s20, 1 }
  0x1e   : > { %384 = sbr.rel (%p381_p10) target bundleno = 753 (0x2f1), region = 52  ;;  %s2206_s2 = sld [smem:[#allocation17_spill]] (!%p381_p10) }
  0x1f   : > { %s2207_s0 = sld [smem:[#allocation15_spill]] (!%p381_p10)  ;;  %s2214_s21 = sadd.s32 (!%p381_p10), 4294967295, %s1684_s22  }
  0x20   : > { %s2208_s1 = sld [smem:[#allocation16_spill]] (!%p381_p10)  ;;  %s2083_s25 = sand.u32 (!%p381_p10), 1, %s2214_s21  }
  0x21   : > { %s2209_s5 = sld [smem:[#allocation20_spill]] (!%p381_p10) }
  0x22   : > { %s2210_s7 = sld [smem:[#allocation22_spill]] (!%p381_p10) }
  0x23   : > { %v1686_v1 = vmov 0   ;;  %s441_s16 = scalar_select %p440_p11, %s1676_s20, 1  ;;  %vm499_vm0 = vcmask 1043456   ;;  %vm486_vm1 = vcmask 31744   ;;  %vm570_vm2 = vcmask 261120  }
  0x24   : > { %v461_v0 = vld [vmem:[%s2206_s2 + $0x18] sm:$0xff]  ;;  %1511 = vset.pattern.permute.xlu0 %v1686_v1  ;;  %1512 = vset.pattern.permute.xlu1 %v1686_v1  ;;  %v459_v2 = vld [vmem:[%s2206_s2 + $0x8] sm:$0xff]  ;;  %v460_v4 = vld [vmem:[%s2206_s2 + $0x10] sm:$0xff]  ;;  %s2211_s3 = sld [smem:[#allocation18_spill]] }
  0x25   : > { %479 = vperm.xlu0 %1511, %v461_v0   ;;  %469 = vperm.xlu1 %1512, %v459_v2   ;;  %s1433_s26 = sshll.u32 %s441_s16, 3  ;;  %v458_v5 = vld [vmem:[%s2206_s2] sm:$0xff]  ;;  %s2212_s4 = sld [smem:[#allocation19_spill]] }
  0x26   : > { %1513 = vset.pattern.permute.xlu2 %v1686_v1  ;;  %s447_s12 = scalar_lea.vmem %s2207_s0, %s1433_s26  ;;  %v454_v6 = vld [vmem:[%s2208_s1] sm:$0xff]  ;;  %v455_v11 = vld [vmem:[%s2208_s1 + $0x8] sm:$0xff]  ;;  %v456_v14 = vld [vmem:[%s2208_s1 + $0x10] sm:$0xff]  ;;  %s1864_s26 = sand.u32 1, %s1668_s18  }
  0x27   : > { %v453_v3 = vld [vmem:[%s447_s12] sm:$0xff]  ;;  %v679_v9 = vld [vmem:[%s2209_s5 + $0x10] sm:$0xff]  ;;  %v680_v10 = vld [vmem:[%s2209_s5 + $0x18] sm:$0xff]  ;;  %s1346_s28 = sshll.u32 %s1864_s26, 6  ;;  %s1348_s13 = sshll.u32 %s1864_s26, 1 }
  0x28   : > { %483 = vst [vmem:[#allocation1] ss:$2 sm:$0xff] %v453_v3  ;;  %v682_v12 = vld [vmem:[%s2209_s5 + $0x28] sm:$0xff]  ;;  %v683_v13 = vld [vmem:[%s2209_s5 + $0x30] sm:$0xff]  ;;  %v994_v15 = vld [vmem:[%s2210_s7] sm:$0xf] }
  0x29   : > { %v457_v16 = vld [vmem:[%s2208_s1 + $0x18] sm:$0xff]  ;;  %s1869_s12 = scalar_lea.vmem [#allocation2], %s1346_s28  ;;  %v677_v39 = vld [vmem:[%s2209_s5] sm:$0xff]  ;;  %v678_v41 = vld [vmem:[%s2209_s5 + $0x8] sm:$0xff]  ;;  %s2035_s14 = scalar_lea.vmem [#allocation6], %s1348_s13 }
  0x2a   : > { %v562_v37 = vld [vmem:[%s2211_s3] sm:$0xff]  ;;  %v563_v38 = vld [vmem:[%s2211_s3 + $0x8] sm:$0xff]  ;;  %703 = vperm.xlu2 %1513, %v677_v39   ;;  %v564_v40 = vld [vmem:[%s2211_s3 + $0x10] sm:$0xff]  ;;  %s2066_s23 = scalar_lea.vmem [#allocation4], %s1346_s28  ;;  %s2213_s6 = sld [smem:[#allocation21_spill]] }
  0x2b   : > { %v565_v42 = vld [vmem:[%s2211_s3 + $0x18] sm:$0xff]  ;;  %v681_v43 = vld [vmem:[%s2209_s5 + $0x20] sm:$0xff]  ;;  %v567_v46 = vld [vmem:[%s2211_s3 + $0x28] sm:$0xff]  ;;  %s1434_s16 = sshll.u32 %s1676_s20, 6  ;;  %s2215_s9 = sld [smem:[#allocation23_spill]] }
  0x2c   : > { %v566_v44 = vld [vmem:[%s2211_s3 + $0x20] sm:$0xff]  ;;  %v684_v45 = vld [vmem:[%s2209_s5 + $0x38] sm:$0xff]  ;;  %v568_v47 = vld [vmem:[%s2211_s3 + $0x30] sm:$0xff]  ;;  %s1122_s24 = sshll.u32 %s2066_s23, 4  ;;  %s1079_s1 = scalar_lea.sflag [#allocation5], %s2083_s25  ;;  %s1123_s24 = int_to_ptr.vmem [resolvable:$true] %s1122_s24 }
  0x2d   : > { %474 = vperm.xlu0 %1511, %v460_v4   ;;  %464 = vperm.xlu1 %1512, %v458_v5   ;;  %v569_v48 = vld [vmem:[%s2211_s3 + $0x38] sm:$0xff] }
  0x2f   : > { %v484_v7 = vld.sshfl [vmem:[#allocation1] sm:$0xff pattern:$0x75316420]  ;;  %v485_v8 = vld.sshfl [vmem:[#allocation1 + $0x8] sm:$0xff pattern:$0x75316420] }
  0x30   : > { %1352 = vmatpush.msk.msra.mxu0 %vm499_vm0, %v484_v7  ;;  %1357 = vmatpush.msk.msra.mxu1 %vm499_vm0, %v485_v8 }
  0x31   : > { %1353 = vmatmul.msk.f32.vlgmr.msra.gmra.mxu0 %vm486_vm1, %v454_v6  ;;  %1358 = vmatmul.msk.f32.vlgmr.msra.gmra.mxu1 %vm486_vm1, %v454_v6  ;;  %s1121_s28 = scalar_lea.hbm %s2215_s9, %s1434_s16  ;;  %s1534_s5 = scalar_lea.hbm %s2215_s9, 128 }
  0x32   : > { %708 = vperm.xlu2 %1513, %v678_v41   ;;  %s1124_s0 = sshll.u32 %s1121_s28, 4  ;;  %s1125_s0 = int_to_ptr.hbm [resolvable:$true] %s1124_s0 }
  0x33   : > { %s1528_s2 = sshra.s32 %s1125_s0, 4  ;;  %s1529_s2 = int_to_ptr.hbm [resolvable:$true] %s1528_s2 }
  0x34   : > { %s1530_s3 = scalar_lea.hbm %s1529_s2, 64  ;;  %p1535_p1 = scmp.lt.s32.totalorder %s1529_s2, %s2215_s9 }
  0x35   : > { %713 = vperm.xlu0 %1511, %v679_v9   ;;  %718 = vperm.xlu1 %1512, %v680_v10   ;;  %p1531_p12 = scmp.ne.s32.totalorder %s1529_s2, %s1530_s3  ;;  %p1536_p2 = scmp.lt.s32.totalorder %s1534_s5, %s1530_s3 }
  0x37   : > { %p1532_p13 = pnand %p1531_p12, %p1792_p4  ;;  %p1537_p3 = por %p1536_p2, %p1535_p1 }
  0x39   : > { %1354 = vmatmul.msk.f32.gmra.mxu0 %vm486_vm1, %v455_v11  ;;  %1359 = vmatmul.msk.f32.gmra.mxu1 %vm486_vm1, %v455_v11  ;;  %p1533_p0 = pneg %p1532_p13 }
  0x3a   : > { %723 = vperm.xlu2 %1513, %v681_v43  }
  0x3b   : > { %p1538_p5 = pnand %p1537_p3, %p1533_p0 }
  0x3d   : > { %728 = vperm.xlu0 %1511, %v682_v12   ;;  %733 = vperm.xlu1 %1512, %v683_v13  }
  0x41   : > { %1355 = vmatmul.msk.f32.gmra.mxu0 %vm486_vm1, %v456_v14  ;;  %1360 = vmatmul.msk.f32.gmra.mxu1 %vm486_vm1, %v456_v14 }
  0x42   : > { %738 = vperm.xlu2 %1513, %v684_v45  }
  0x45   : > { %997 = vperm.xlu0 %1511, %v994_v15  }
  0x49   : > { %1356 = vmatmul.msk.f32.gmra.mxu0 %vm486_vm1, %v457_v16  ;;  %1361 = vmatmul.msk.f32.gmra.mxu1 %vm486_vm1, %v457_v16 }
  0x84   : > { %v704_v57 = vpop.permute.xlu2 %703 }
  0x8c   : > { %v709_v60 = vpop.permute.xlu2 %708 }
  0x94   : > { %v724_v1 = vpop.permute.xlu2 %723 }
  0x97   : > { %v470_v17 = vpop.permute.xlu1 %469  ;;  %v480_v23 = vpop.permute.xlu0 %479 }
  0x9f   : > { %v465_v18 = vpop.permute.xlu1 %464  ;;  %v475_v28 = vpop.permute.xlu0 %474 }
  0xa7   : > { %v714_v63 = vpop.permute.xlu0 %713  ;;  %v719_v0 = vpop.permute.xlu1 %718 }
  0xae   : > { %v521_v19 = vpop.f32.mrf.mxu0  ;;  %v550_v20 = vpop.f32.mrf.mxu1 }
  0xaf   : > { %v522_v21 = vadd.f32 %v521_v19, %v465_v18  ;;  %v551_v22 = vadd.f32 %v550_v20, %v465_v18 }
  0xb1   : > { %1043 = vst [vmem:[%s1869_s12] sm:$0xff] %v522_v21 }
  0xb2   : > { %1044 = vst [vmem:[%s1869_s12 + $0x8] sm:$0xff] %v551_v22 }
  0xb6   : > { %v524_v24 = vpop.f32.mrf.mxu0  ;;  %v553_v25 = vpop.f32.mrf.mxu1 }
  0xb7   : > { %v525_v26 = vadd.f32 %v524_v24, %v470_v17  ;;  %v554_v27 = vadd.f32 %v553_v25, %v470_v17  ;;  %v729_v24 = vpop.permute.xlu0 %728 }
  0xb9   : > { %1045 = vst [vmem:[%s1869_s12 + $0x10] sm:$0xff] %v525_v26 }
  0xba   : > { %1046 = vst [vmem:[%s1869_s12 + $0x18] sm:$0xff] %v554_v27 }
  0xbe   : > { %v527_v29 = vpop.f32.mrf.mxu0  ;;  %v556_v30 = vpop.f32.mrf.mxu1 }
  0xbf   : > { %v528_v31 = vadd.f32 %v527_v29, %v475_v28  ;;  %v557_v32 = vadd.f32 %v556_v30, %v475_v28  ;;  %v734_v29 = vpop.permute.xlu1 %733 }
  0xc1   : > { %1047 = vst [vmem:[%s1869_s12 + $0x20] sm:$0xff] %v528_v31 }
  0xc2   : > { %1048 = vst [vmem:[%s1869_s12 + $0x28] sm:$0xff] %v557_v32 }
  0xc6   : > { %v530_v33 = vpop.f32.mrf.mxu0  ;;  %v559_v34 = vpop.f32.mrf.mxu1 }
  0xc7   : > { %v531_v35 = vadd.f32 %v530_v33, %v480_v23  ;;  %v560_v36 = vadd.f32 %v559_v34, %v480_v23 }
  0xc9   : > { %1049 = vst [vmem:[%s1869_s12 + $0x30] sm:$0xff] %v531_v35  ;;  %607 = vmatpush.msra.mxu2 %v531_v35  ;;  %648 = vmatpush.msra.mxu3 %v560_v36 }
  0xca   : > { %1050 = vst [vmem:[%s1869_s12 + $0x38] sm:$0xff] %v560_v36 }
  0xcb   : > { %608 = vmatpush.msra.mxu2 %v528_v31  ;;  %649 = vmatpush.msra.mxu3 %v557_v32 }
  0xcd   : > { %609 = vmatpush.msra.mxu2 %v525_v26  ;;  %650 = vmatpush.msra.mxu3 %v554_v27 }
  0xcf   : > { %610 = vmatpush.msra.mxu2 %v522_v21  ;;  %651 = vmatpush.msra.mxu3 %v551_v22 }
  0xd0   : > { %1362 = vmatmul.msk.f32.vlgmr.msra.gmra.mxu2 %vm570_vm2, %v562_v37  ;;  %1370 = vmatmul.msk.f32.vlgmr.msra.gmra.mxu3 %vm570_vm2, %v562_v37 }
  0xd8   : > { %1363 = vmatmul.msk.f32.gmra.mxu2 %vm570_vm2, %v563_v38  ;;  %1371 = vmatmul.msk.f32.gmra.mxu3 %vm570_vm2, %v563_v38 }
  0xe0   : > { %1364 = vmatmul.msk.f32.gmra.mxu2 %vm570_vm2, %v564_v40  ;;  %1372 = vmatmul.msk.f32.gmra.mxu3 %vm570_vm2, %v564_v40 }
  0xe8   : > { %1365 = vmatmul.msk.f32.gmra.mxu2 %vm570_vm2, %v565_v42  ;;  %1373 = vmatmul.msk.f32.gmra.mxu3 %vm570_vm2, %v565_v42 }
  0xf0   : > { %1366 = vmatmul.msk.f32.gmra.mxu2 %vm570_vm2, %v566_v44  ;;  %1374 = vmatmul.msk.f32.gmra.mxu3 %vm570_vm2, %v566_v44  ;;  %v739_v44 = vpop.permute.xlu2 %738 }
  0xf8   : > { %1367 = vmatmul.msk.f32.gmra.mxu2 %vm570_vm2, %v567_v46  ;;  %1375 = vmatmul.msk.f32.gmra.mxu3 %vm570_vm2, %v567_v46 }
 0x100   : > { %1368 = vmatmul.msk.f32.gmra.mxu2 %vm570_vm2, %v568_v47  ;;  %1376 = vmatmul.msk.f32.gmra.mxu3 %vm570_vm2, %v568_v47 }
 0x108   : > { %1369 = vmatmul.msk.f32.gmra.mxu2 %vm570_vm2, %v569_v48  ;;  %1377 = vmatmul.msk.f32.gmra.mxu3 %vm570_vm2, %v569_v48 }
 0x153   : > { %v612_v49 = vpop.f32.mrf.mxu2  ;;  %v653_v50 = vpop.f32.mrf.mxu3 }
 0x154   : > { %v685_v8 = vmul.f32 2.0, %v612_v49  ;;  %v686_v9 = vmul.f32 2.0, %v653_v50 }
 0x156   : > { %v1939_v20 = vsub.f32 %v704_v57, %v685_v8  ;;  %v1941_v21 = vsub.f32 %v704_v57, %v686_v9 }
 0x15b   : > { %v615_v51 = vpop.f32.mrf.mxu2  ;;  %v656_v52 = vpop.f32.mrf.mxu3 }
 0x15c   : > { %v687_v10 = vmul.f32 2.0, %v615_v51  ;;  %v688_v11 = vmul.f32 2.0, %v656_v52 }
 0x15e   : > { %v743_v25 = vsub.f32 %v709_v60, %v687_v10  ;;  %v1943_v26 = vsub.f32 %v709_v60, %v688_v11 }
 0x163   : > { %v618_v53 = vpop.f32.mrf.mxu2  ;;  %v659_v54 = vpop.f32.mrf.mxu3 }
 0x164   : > { %v689_v2 = vmul.f32 2.0, %v618_v53  ;;  %v690_v3 = vmul.f32 2.0, %v659_v54 }
 0x166   : > { %v1931_v16 = vsub.f32 %v714_v63, %v689_v2  ;;  %v1933_v17 = vsub.f32 %v714_v63, %v690_v3 }
 0x168   : > { %v757_v32 = vmin.f32 %v1939_v20, %v1931_v16  ;;  %v770_v33 = vmin.f32 %v1941_v21, %v1933_v17 }
 0x16b   : > { %v621_v55 = vpop.f32.mrf.mxu2  ;;  %v662_v56 = vpop.f32.mrf.mxu3 }
 0x16c   : > { %v691_v4 = vmul.f32 2.0, %v621_v55  ;;  %v692_v5 = vmul.f32 2.0, %v662_v56 }
 0x16e   : > { %v1935_v18 = vsub.f32 %v719_v0, %v691_v4  ;;  %v1937_v19 = vsub.f32 %v719_v0, %v692_v5 }
 0x170   : > { %v758_v34 = vmin.f32 %v743_v25, %v1935_v18  ;;  %v771_v35 = vmin.f32 %v1943_v26, %v1937_v19 }
 0x173   : > { %v624_v58 = vpop.f32.mrf.mxu2  ;;  %v665_v59 = vpop.f32.mrf.mxu3 }
 0x174   : > { %v693_v12 = vmul.f32 2.0, %v624_v58  ;;  %v694_v13 = vmul.f32 2.0, %v665_v59  ;;  %v783_v59 = vlaneseq }
 0x176   : > { %v749_v27 = vsub.f32 %v724_v1, %v693_v12  ;;  %v1945_v28 = vsub.f32 %v724_v1, %v694_v13  ;;  %v784_v0 = vshrl.u32 %v783_v59, 7 }
 0x178   : > { %v759_v42 = vmin.f32 %v757_v32, %v749_v27  ;;  %v772_v43 = vmin.f32 %v770_v33, %v1945_v28  ;;  %v785_v4 = vadd.s32 8, %v784_v0  ;;  %v786_v5 = vadd.s32 16, %v784_v0 }
 0x179   : > { %v789_v8 = vadd.s32 40, %v784_v0  ;;  %v790_v9 = vadd.s32 48, %v784_v0  ;;  %v791_v10 = vadd.s32 56, %v784_v0 }
 0x17b   : > { %v627_v61 = vpop.f32.mrf.mxu2  ;;  %v668_v62 = vpop.f32.mrf.mxu3 }
 0x17c   : > { %v695_v14 = vmul.f32 2.0, %v627_v61  ;;  %v696_v15 = vmul.f32 2.0, %v668_v62 }
 0x17e   : > { %v751_v30 = vsub.f32 %v729_v24, %v695_v14  ;;  %v1947_v31 = vsub.f32 %v729_v24, %v696_v15 }
 0x180   : > { %v760_v45 = vmin.f32 %v758_v34, %v751_v30  ;;  %v773_v46 = vmin.f32 %v771_v35, %v1947_v31 }
 0x183   : > { %v630_v6 = vpop.f32.mrf.mxu2  ;;  %v671_v7 = vpop.f32.mrf.mxu3 }
 0x184   : > { %v697_v22 = vmul.f32 2.0, %v630_v6  ;;  %v698_v23 = vmul.f32 2.0, %v671_v7  ;;  %v787_v6 = vadd.s32 24, %v784_v0  ;;  %v788_v7 = vadd.s32 32, %v784_v0 }
 0x186   : > { %v753_v38 = vsub.f32 %v734_v29, %v697_v22  ;;  %v1956_v39 = vsub.f32 %v734_v29, %v698_v23 }
 0x188   : > { %v761_v49 = vmin.f32 %v759_v42, %v753_v38  ;;  %v774_v50 = vmin.f32 %v772_v43, %v1956_v39 }
 0x18b   : > { %v633_v36 = vpop.f32.mrf.mxu2  ;;  %v674_v37 = vpop.f32.mrf.mxu3 }
 0x18c   : > { %v699_v40 = vmul.f32 2.0, %v633_v36  ;;  %v700_v41 = vmul.f32 2.0, %v674_v37 }
 0x18e   : > { %v755_v47 = vsub.f32 %v739_v44, %v699_v40  ;;  %v1960_v48 = vsub.f32 %v739_v44, %v700_v41 }
 0x190   : > { %v762_v51 = vmin.f32 %v760_v45, %v755_v47  ;;  %v775_v52 = vmin.f32 %v773_v46, %v1960_v48 }
 0x192   : > { %v763_v53 = vmin.f32 %v761_v49, %v762_v51  ;;  %v776_v54 = vmin.f32 %v774_v50, %v775_v52  ;;  %v1687_v51 = vmov 1.0  }
 0x194   : > { %v764_v55 = vrot.slane %v763_v53, 4  ;;  %v777_v56 = vrot.slane %v776_v54, 4 }
 0x196   : > { %v765_v57 = vmin.f32 %v763_v53, %v764_v55  ;;  %v778_v58 = vmin.f32 %v776_v54, %v777_v56 }
 0x198   : > { %v766_v60 = vrot.slane %v765_v57, 2  ;;  %v779_v61 = vrot.slane %v778_v58, 2 }
 0x19a   : > { %v767_v62 = vmin.f32 %v765_v57, %v766_v60  ;;  %v780_v63 = vmin.f32 %v778_v58, %v779_v61  ;;  %v918_v57 = vld [vmem:[%s2212_s4] sm:$0xff]  ;;  %v919_v58 = vld [vmem:[%s2212_s4 + $0x8] sm:$0xff]  ;;  %v921_v60 = vld [vmem:[%s2212_s4 + $0x18] sm:$0xff] }
 0x19c   : > { %v768_v1 = vrot.slane %v767_v62, 1  ;;  %v781_v2 = vrot.slane %v780_v63, 1 }
 0x19e   : > { %v769_v3 = vmin.f32 %v767_v62, %v768_v1  ;;  %v782_v11 = vmin.f32 %v780_v63, %v781_v2 }
 0x1a0   : > { %vm806_vm3 = vcmp.eq.f32.partialorder %v755_v47, %v769_v3  ;;  %vm792_vm4 = vcmp.eq.f32.partialorder %v1939_v20, %v769_v3  ;;  %vm794_vm5 = vcmp.eq.f32.partialorder %v743_v25, %v769_v3  ;;  %vm796_vm6 = vcmp.eq.f32.partialorder %v1931_v16, %v769_v3 }
 0x1a1   : > { %vm798_vm7 = vcmp.eq.f32.partialorder %v1935_v18, %v769_v3  ;;  %vm800_vm8 = vcmp.eq.f32.partialorder %v749_v27, %v769_v3  ;;  %vm802_vm9 = vcmp.eq.f32.partialorder %v751_v30, %v769_v3  ;;  %vm804_vm10 = vcmp.eq.f32.partialorder %v753_v38, %v769_v3 }
 0x1a2   : > { %v1968_v12 = vsel %vm792_vm4, %v784_v0, 64  ;;  %v1970_v13 = vsel %vm794_vm5, %v785_v4, 64  ;;  %v1972_v14 = vsel %vm796_vm6, %v786_v5, 64  ;;  %v1974_v15 = vsel %vm798_vm7, %v787_v6, 64 }
 0x1a3   : > { %v1976_v22 = vsel %vm800_vm8, %v788_v7, 64  ;;  %v1978_v23 = vsel %vm802_vm9, %v789_v8, 64  ;;  %v1980_v20 = vsel %vm804_vm10, %v790_v9, 64  ;;  %v822_v16 = vsel %vm806_vm3, %v791_v10, 64 }
 0x1a4   : > { %vm824_vm11 = vcmp.lt.s32.totalorder %v1968_v12, %v1972_v14  ;;  %vm826_vm12 = vcmp.lt.s32.totalorder %v1970_v13, %v1974_v15  ;;  %vm793_vm13 = vcmp.eq.f32.partialorder %v1941_v21, %v782_v11  ;;  %vm795_vm14 = vcmp.eq.f32.partialorder %v1943_v26, %v782_v11 }
 0x1a5   : > { %v825_v18 = vsel %vm824_vm11, %v1968_v12, %v1972_v14  ;;  %v827_v24 = vsel %vm826_vm12, %v1970_v13, %v1974_v15  ;;  %vm797_vm3 = vcmp.eq.f32.partialorder %v1933_v17, %v782_v11  ;;  %vm799_vm4 = vcmp.eq.f32.partialorder %v1937_v19, %v782_v11 }
 0x1a6   : > { %vm828_vm15 = vcmp.lt.s32.totalorder %v825_v18, %v1976_v22  ;;  %vm830_vm1 = vcmp.lt.s32.totalorder %v827_v24, %v1978_v23  ;;  %vm801_vm5 = vcmp.eq.f32.partialorder %v1945_v28, %v782_v11  ;;  %vm803_vm6 = vcmp.eq.f32.partialorder %v1947_v31, %v782_v11 }
 0x1a7   : > { %v829_v25 = vsel %vm828_vm15, %v825_v18, %v1976_v22  ;;  %v831_v27 = vsel %vm830_vm1, %v827_v24, %v1978_v23  ;;  %v2002_v21 = vsel %vm793_vm13, %v784_v0, 64  ;;  %v2004_v26 = vsel %vm795_vm14, %v785_v4, 64  ;;  %v993_v4 = vld [vmem:[%s2213_s6] sm:$0xf] }
 0x1a8   : > { %vm832_vm7 = vcmp.lt.s32.totalorder %v829_v25, %v1980_v20  ;;  %vm834_vm8 = vcmp.lt.s32.totalorder %v831_v27, %v822_v16  ;;  %v2007_v30 = vsel %vm797_vm3, %v786_v5, 64  ;;  %v2009_v19 = vsel %vm799_vm4, %v787_v6, 64 }
 0x1a9   : > { %v833_v29 = vsel %vm832_vm7, %v829_v25, %v1980_v20  ;;  %v835_v17 = vsel %vm834_vm8, %v831_v27, %v822_v16  ;;  %vm807_vm9 = vcmp.eq.f32.partialorder %v1960_v48, %v782_v11  ;;  %vm805_vm11 = vcmp.eq.f32.partialorder %v1956_v39, %v782_v11 }
 0x1aa   : > { %vm836_vm10 = vcmp.lt.s32.totalorder %v833_v29, %v835_v17  ;;  %v2013_v32 = vsel %vm801_vm5, %v788_v7, 64  ;;  %vm847_vm12 = vcmp.lt.s32.totalorder %v2002_v21, %v2007_v30  ;;  %vm849_vm13 = vcmp.lt.s32.totalorder %v2004_v26, %v2009_v19 }
 0x1ab   : > { %v837_v28 = vsel %vm836_vm10, %v833_v29, %v835_v17  ;;  %v819_v34 = vsel %vm803_vm6, %v789_v8, 64  ;;  %v848_v35 = vsel %vm847_vm12, %v2002_v21, %v2007_v30  ;;  %v850_v36 = vsel %vm849_vm13, %v2004_v26, %v2009_v19 }
 0x1ac   : > { %v838_v33 = vrot.slane %v837_v28, 4  ;;  %v821_v37 = vsel %vm805_vm11, %v790_v9, 64  ;;  %vm851_vm14 = vcmp.lt.s32.totalorder %v848_v35, %v2013_v32  ;;  %vm853_vm15 = vcmp.lt.s32.totalorder %v850_v36, %v819_v34 }
 0x1ad   : > { %v823_v38 = vsel %vm807_vm9, %v791_v10, 64  ;;  %v852_v39 = vsel %vm851_vm14, %v848_v35, %v2013_v32  ;;  %v854_v40 = vsel %vm853_vm15, %v850_v36, %v819_v34 }
 0x1ae   : > { %vm839_vm1 = vcmp.lt.s32.totalorder %v837_v28, %v838_v33  ;;  %vm855_vm3 = vcmp.lt.s32.totalorder %v852_v39, %v821_v37  ;;  %vm857_vm4 = vcmp.lt.s32.totalorder %v854_v40, %v823_v38 }
 0x1af   : > { %v840_v41 = vsel %vm839_vm1, %v837_v28, %v838_v33  ;;  %v856_v42 = vsel %vm855_vm3, %v852_v39, %v821_v37  ;;  %v858_v43 = vsel %vm857_vm4, %v854_v40, %v823_v38  ;;  %vm1060_vm3 = vcmask 1040384  }
 0x1b0   : > { %v841_v31 = vrot.slane %v840_v41, 2  ;;  %vm859_vm5 = vcmp.lt.s32.totalorder %v856_v42, %v858_v43 }
 0x1b1   : > { %v860_v44 = vsel %vm859_vm5, %v856_v42, %v858_v43  ;;  %vm1064_vm5 = vcmp.lt.s32.totalorder %v783_v59, 256  ;;  %v920_v59 = vld [vmem:[%s2212_s4 + $0x10] sm:$0xff] }
 0x1b2   : > { %vm842_vm6 = vcmp.lt.s32.totalorder %v840_v41, %v841_v31  ;;  %v861_v46 = vrot.slane %v860_v44, 4 }
 0x1b3   : > { %v843_v45 = vsel %vm842_vm6, %v840_v41, %v841_v31 }
 0x1b4   : > { %v844_v47 = vrot.slane %v843_v45, 1  ;;  %vm862_vm7 = vcmp.lt.s32.totalorder %v860_v44, %v861_v46 }
 0x1b5   : > { %v863_v48 = vsel %vm862_vm7, %v860_v44, %v861_v46 }
 0x1b6   : > { %vm845_vm8 = vcmp.lt.s32.totalorder %v843_v45, %v844_v47  ;;  %v864_v50 = vrot.slane %v863_v48, 2 }
 0x1b7   : > { %v846_v49 = vsel %vm845_vm8, %v843_v45, %v844_v47 }
 0x1b8   : > { %vm884_vm9 = vcmp.eq.s32.totalorder %v822_v16, %v846_v49  ;;  %vm865_vm10 = vcmp.lt.s32.totalorder %v863_v48, %v864_v50  ;;  %vm882_vm11 = vcmp.eq.s32.totalorder %v1980_v20, %v846_v49  ;;  %vm880_vm12 = vcmp.eq.s32.totalorder %v1978_v23, %v846_v49 }
 0x1b9   : > { %1394 = vmatpush.msk.msrb.mxu0 %vm884_vm9, %v1687_v51  ;;  %v866_v52 = vsel %vm865_vm10, %v863_v48, %v864_v50  ;;  %vm878_vm14 = vcmp.eq.s32.totalorder %v1976_v22, %v846_v49  ;;  %vm876_vm1 = vcmp.eq.s32.totalorder %v1974_v15, %v846_v49  ;;  %vm874_vm6 = vcmp.eq.s32.totalorder %v1972_v14, %v846_v49 }
 0x1ba   : > { %v867_v53 = vrot.slane %v866_v52, 1  ;;  %vm872_vm8 = vcmp.eq.s32.totalorder %v1970_v13, %v846_v49  ;;  %vm922_vm10 = vcmask 523264  }
 0x1bb   : > { %1395 = vmatpush.msk.msrb.mxu0 %vm882_vm11, %v1687_v51  ;;  %vm870_vm11 = vcmp.eq.s32.totalorder %v1968_v12, %v846_v49 }
 0x1bc   : > { %vm868_vm13 = vcmp.lt.s32.totalorder %v866_v52, %v867_v53 }
 0x1bd   : > { %1396 = vmatpush.msk.msrb.mxu0 %vm880_vm12, %v1687_v51  ;;  %v869_v54 = vsel %vm868_vm13, %v866_v52, %v867_v53 }
 0x1be   : > { %vm885_vm15 = vcmp.eq.s32.totalorder %v823_v38, %v869_v54  ;;  %vm883_vm4 = vcmp.eq.s32.totalorder %v821_v37, %v869_v54  ;;  %v1059_v55 = vrot.slane %v869_v54, 7  ;;  %vm881_vm7 = vcmp.eq.s32.totalorder %v819_v34, %v869_v54 }
 0x1bf   : > { %1397 = vmatpush.msk.msrb.mxu0 %vm878_vm14, %v1687_v51  ;;  %1406 = vmatpush.msk.msrb.mxu1 %vm885_vm15, %v1687_v51  ;;  %vm879_vm9 = vcmp.eq.s32.totalorder %v2013_v32, %v869_v54  ;;  %vm877_vm12 = vcmp.eq.s32.totalorder %v2009_v19, %v869_v54  ;;  %vm875_vm13 = vcmp.eq.s32.totalorder %v2007_v30, %v869_v54 }
 0x1c0   : > { %v1061_v56 = vsel %vm1060_vm3, %v846_v49, %v1059_v55  ;;  %vm873_vm14 = vcmp.eq.s32.totalorder %v2004_v26, %v869_v54  ;;  %vm871_vm15 = vcmp.eq.s32.totalorder %v2002_v21, %v869_v54 }
 0x1c1   : > { %1398 = vmatpush.msk.msrb.mxu0 %vm876_vm1, %v1687_v51  ;;  %1407 = vmatpush.msk.msrb.mxu1 %vm883_vm4, %v1687_v51  ;;  %1066 = vst.msk [vmem:[%s2035_s14] sm:$0x3] %vm1064_vm5, %v1061_v56 }
 0x1c3   : > { %1399 = vmatpush.msk.msrb.mxu0 %vm874_vm6, %v1687_v51  ;;  %1408 = vmatpush.msk.msrb.mxu1 %vm881_vm7, %v1687_v51 }
 0x1c5   : > { %1400 = vmatpush.msk.msrb.mxu0 %vm872_vm8, %v1687_v51  ;;  %1409 = vmatpush.msk.msrb.mxu1 %vm879_vm9, %v1687_v51 }
 0x1c7   : > { %1401 = vmatpush.msk.msrb.mxu0 %vm870_vm11, %v1687_v51  ;;  %1410 = vmatpush.msk.msrb.mxu1 %vm877_vm12, %v1687_v51 }
 0x1c8   : > { %1402 = vmatmul.msk.f32.vlgmr.msrb.gmra.mxu0 %vm922_vm10, %v918_v57 }
 0x1c9   : > { %1411 = vmatpush.msk.msrb.mxu1 %vm875_vm13, %v1687_v51 }
 0x1cb   : > { %1412 = vmatpush.msk.msrb.mxu1 %vm873_vm14, %v1687_v51 }
 0x1cd   : > { %1413 = vmatpush.msk.msrb.mxu1 %vm871_vm15, %v1687_v51 }
 0x1ce   : > { %1414 = vmatmul.msk.f32.vlgmr.msrb.gmra.mxu1 %vm922_vm10, %v918_v57 }
 0x1d0   : > { %1403 = vmatmul.msk.f32.gmra.mxu0 %vm922_vm10, %v919_v58 }
 0x1d6   : > { %1415 = vmatmul.msk.f32.gmra.mxu1 %vm922_vm10, %v919_v58 }
 0x1d8   : > { %1404 = vmatmul.msk.f32.gmra.mxu0 %vm922_vm10, %v920_v59 }
 0x1de   : > { %1416 = vmatmul.msk.f32.gmra.mxu1 %vm922_vm10, %v920_v59 }
 0x1e0   : > { %1405 = vmatmul.msk.f32.gmra.mxu0 %vm922_vm10, %v921_v60 }
 0x1e6   : > { %1417 = vmatmul.msk.f32.gmra.mxu1 %vm922_vm10, %v921_v60 }
 0x245   : > { %v952_v61 = vpop.f32.mrf.mxu0 }
 0x246   : > { %1051 = vst [vmem:[%s2066_s23] sm:$0xff] %v952_v61 }
 0x24b   : > { %v981_v62 = vpop.f32.mrf.mxu1 }
 0x24c   : > { %1052 = vst [vmem:[%s2066_s23 + $0x8] sm:$0xff] %v981_v62 }
 0x24d   : > { %v955_v63 = vpop.f32.mrf.mxu0 }
 0x24e   : > { %1053 = vst [vmem:[%s2066_s23 + $0x10] sm:$0xff] %v955_v63 }
 0x253   : > { %v984_v0 = vpop.f32.mrf.mxu1 }
 0x254   : > { %1054 = vst [vmem:[%s2066_s23 + $0x18] sm:$0xff] %v984_v0 }
 0x255   : > { %v958_v1 = vpop.f32.mrf.mxu0 }
 0x256   : > { %1055 = vst [vmem:[%s2066_s23 + $0x20] sm:$0xff] %v958_v1 }
 0x25b   : > { %v987_v2 = vpop.f32.mrf.mxu1 }
 0x25c   : > { %1056 = vst [vmem:[%s2066_s23 + $0x28] sm:$0xff] %v987_v2 }
 0x25d   : > { %v961_v3 = vpop.f32.mrf.mxu0 }
 0x25e   : > { %1057 = vst [vmem:[%s2066_s23 + $0x30] sm:$0xff] %v961_v3  ;;  %1015 = vmatpush.msra.mxu0 %v961_v3 }
 0x260   : > { %1016 = vmatpush.msra.mxu0 %v958_v1 }
 0x262   : > { %1017 = vmatpush.msra.mxu0 %v955_v63 }
 0x263   : > { %v990_v5 = vpop.f32.mrf.mxu1 }
 0x264   : > { %1018 = vmatpush.msra.mxu0 %v952_v61  ;;  %1058 = vst [vmem:[%s2066_s23 + $0x38] sm:$0xff] %v990_v5  ;;  %1035 = vmatpush.msra.mxu1 %v990_v5 }
 0x265   : > { %1418 = vmatmul.msk.f32.vlgmr.msra.gmra.mxu0 %vm570_vm2, %v993_v4 }
 0x266   : > { %1036 = vmatpush.msra.mxu1 %v987_v2 }
 0x268   : > { %1037 = vmatpush.msra.mxu1 %v984_v0 }
 0x26a   : > { %1038 = vmatpush.msra.mxu1 %v981_v62 }
 0x26b   : > { %1419 = vmatmul.msk.f32.vlgmr.msra.gmra.mxu1 %vm570_vm2, %v993_v4 }
 0x26c   : > { %1541 = shalt.err (!%p1538_p5)
}
 0x26d   : > { %s1688_s23 = smov 256   ;;  %s1689_s13 = smov 16  }
 0x26e   : > { %1438 = dma.vmem_to_hbm [thread:$0]  (%p1792_p4), %s1123_s24, 1024, %s1125_s0, %s1079_s1, %s1688_s23, %s1688_s23, %s1689_s13  }
 0x26f   : > { %s1102_s6 = scalar_lea.hbm %s2184_s8, %s1434_s16  ;;  %s1103_s2 = sshll.u32 %s1869_s12, 4  ;;  %s1104_s2 = int_to_ptr.vmem [resolvable:$true] %s1103_s2 }
 0x270   : > { %s1105_s3 = sshll.u32 %s1102_s6, 4  ;;  %s1428_s5 = sshll.u32 %s1676_s20, 1  ;;  %s1106_s3 = int_to_ptr.hbm [resolvable:$true] %s1105_s3 }
 0x271   : > { %s1074_s7 = scalar_lea.sflag [#allocation3], %s1864_s26  ;;  %s1556_s28 = sshra.s32 %s1106_s3, 4  ;;  %s1557_s28 = int_to_ptr.hbm [resolvable:$true] %s1556_s28 }
 0x272   : > { %s1558_s21 = scalar_lea.hbm %s1557_s28, 64  ;;  %s1562_s0 = scalar_lea.hbm %s2184_s8, 128 }
 0x273   : > { %p1559_p6 = scmp.ne.s32.totalorder %s1557_s28, %s1558_s21  ;;  %p1563_p10 = scmp.lt.s32.totalorder %s1557_s28, %s2184_s8 }
 0x274   : > { %p1564_p11 = scmp.lt.s32.totalorder %s1562_s0, %s1558_s21 }
 0x275   : > { %p1560_p7 = pnand %p1559_p6, %p1792_p4 }
 0x276   : > { %p1565_p12 = por %p1564_p11, %p1563_p10 }
 0x277   : > { %p1561_p9 = pneg %p1560_p7 }
 0x279   : > { %p1566_p13 = pnand %p1565_p12, %p1561_p9 }
 0x27b   : > { %1569 = shalt.err (!%p1566_p13)
}
 0x27c   : > { %1437 = dma.vmem_to_hbm [thread:$0]  (%p1792_p4), %s1104_s2, 1024, %s1106_s3, %s1074_s7, %s1688_s23, %s1688_s23, %s1689_s13  }
 0x27d   : > { %s1139_s15 = scalar_lea.hbm %s2186_s10, %s1428_s5  ;;  %s1141_s6 = sshll.u32 %s2035_s14, 4  ;;  %s1142_s6 = int_to_ptr.vmem [resolvable:$true] %s1141_s6 }
 0x27e   : > { %s1143_s9 = sshll.u32 %s1139_s15, 4  ;;  %s1590_s24 = scalar_lea.hbm %s2186_s10, 4  ;;  %s1144_s9 = int_to_ptr.hbm [resolvable:$true] %s1143_s9 }
 0x27f   : > { %s1584_s30 = sshra.s32 %s1144_s9, 4  ;;  %s1585_s30 = int_to_ptr.hbm [resolvable:$true] %s1584_s30 }
 0x280   : > { %s1586_s28 = scalar_lea.hbm %s1585_s30, 2  ;;  %p1591_p3 = scmp.lt.s32.totalorder %s1585_s30, %s2186_s10 }
 0x281   : > { %p1587_p0 = scmp.ne.s32.totalorder %s1585_s30, %s1586_s28  ;;  %p1592_p5 = scmp.lt.s32.totalorder %s1590_s24, %s1586_s28 }
 0x283   : > { %p1588_p1 = pnand %p1587_p0, %p1792_p4  ;;  %p1593_p6 = por %p1592_p5, %p1591_p3 }
 0x285   : > { %p1589_p2 = pneg %p1588_p1 }
 0x287   : > { %p1594_p7 = pnand %p1593_p6, %p1589_p2 }
 0x289   : > { %1597 = shalt.err (!%p1594_p7)
}
 0x28a   : > { %1439 = dma.vmem_to_hbm [thread:$0]  (%p1792_p4), %s1142_s6, 32, %s1144_s9, %s1079_s1   ;;  %v998_v6 = vpop.permute.xlu0 %997 }
 0x28b   : > { %s1349_s14 = sshll.u32 %s1864_s26, 3  ;;  %s1436_s2 = sshll.u32 %s1676_s20, 3 }
 0x28c   : > { %s1156_s7 = scalar_lea.hbm %s2187_s11, %s1436_s2  ;;  %s438_s4 = scalar_lea.vmem [#allocation7], %s1349_s14 }
 0x28d   : > { %s1158_s12 = sshll.u32 %s438_s4, 4  ;;  %s1160_s16 = sshll.u32 %s1156_s7, 4  ;;  %s1159_s12 = int_to_ptr.vmem [resolvable:$true] %s1158_s12  ;;  %s1161_s16 = int_to_ptr.hbm [resolvable:$true] %s1160_s16 }
 0x28e   : > { %s1089_s1 = scalar_lea.sflag [#allocation8], %s1864_s26  ;;  %s1612_s20 = sshra.s32 %s1161_s16, 4  ;;  %s1613_s20 = int_to_ptr.hbm [resolvable:$true] %s1612_s20 }
 0x28f   : > { %s1614_s25 = scalar_lea.hbm %s1613_s20, 8  ;;  %s1618_s9 = scalar_lea.hbm %s2187_s11, 16 }
 0x290   : > { %p1615_p9 = scmp.ne.s32.totalorder %s1613_s20, %s1614_s25  ;;  %p1619_p12 = scmp.lt.s32.totalorder %s1613_s20, %s2187_s11 }
 0x291   : > { %p1620_p13 = scmp.lt.s32.totalorder %s1618_s9, %s1614_s25 }
 0x292   : > { %p1616_p10 = pnand %p1615_p9, %p1792_p4 }
 0x293   : > { %p1621_p0 = por %p1620_p13, %p1619_p12 }
 0x294   : > { %p1617_p11 = pneg %p1616_p10 }
 0x296   : > { %p1622_p1 = pnand %p1621_p0, %p1617_p11 }
 0x2e2   : > { %v1020_v7 = vpop.f32.mrf.mxu0 }
 0x2e3   : > { %v1021_v10 = vadd.f32 %v1020_v7, %v998_v6 }
 0x2e8   : > { %v1040_v8 = vpop.f32.mrf.mxu1 }
 0x2e9   : > { %v1041_v9 = vadd.f32 %v1040_v8, %v998_v6 }
 0x2eb   : > { %v1069_v11 = vrot.slane %v1041_v9, 4 }
 0x2ed   : > { %v1070_v12 = vsel %vm499_vm0, %v1021_v10, %v1069_v11 }
 0x2ee   : > { %1072 = vst [vmem:[%s438_s4] sm:$0xff] %v1070_v12 }
 0x2ef   : > { %1625 = shalt.err (!%p1622_p1)
}
 0x2f0   : > { %1440 = dma.vmem_to_hbm [thread:$0]  (%p1792_p4), %s1159_s12, 128, %s1161_s16, %s1089_s1  }
 0x2f1 PF: > { %p1458_p2 = scmp.ge.s32.totalorder %s1684_s22, 2  ;;  %s1172_s26 = sand.u32 1, %s1664_s17  }
 0x2f2   : > { %s1173_s21 = scalar_lea.sflag [#allocation3], %s1172_s26 }
 0x2f3   : > { %p1446_p3 = pnand %p1458_p2, %p1801_p8 }
 0x2f5   : > { %p1447_p5 = pneg %p1446_p3 }
 0x2f7   : > { %1651 = dma.done.wait (%p1447_p5), %s1173_s21, 1024  }
 0x2f8   : > { %1653 = vsyncadd (%p1447_p5), %s1173_s21, 4294966272  ;;  %s2216_s0 = sadd.s32 4294967294, %s1684_s22  }
 0x2f9   : > { %s1182_s24 = sand.u32 1, %s2216_s0  }
 0x2fa   : > { %s1183_s23 = scalar_lea.sflag [#allocation5], %s1182_s24 }
 0x2fb   : > { %1655 = dma.done.wait (%p1447_p5), %s1183_s23, 1056  }
 0x2fc   : > { %1657 = vsyncadd (%p1447_p5), %s1183_s23, 4294966240  ;;  %s1203_s27 = scalar_lea.sflag [#allocation8], %s1172_s26 }
 0x2fd   : > { %1659 = dma.done.wait (%p1447_p5), %s1203_s27, 128  }
 0x2fe   : > { %1661 = vsyncadd (%p1447_p5), %s1203_s27, 4294967168  ;;  %s31_s22 = sadd.s32 1, %s1684_s22   ;;  %s2217_s29 = sld [smem:[#allocation14_spill]] }
 0x2ff   : > { %p28_p4 = scmp.ge.s32.totalorder %s31_s22, 4   ;;  %s2218_s20 = sld [smem:[#allocation12_spill]] }
 0x300   : > { %s2219_s21 = sld [smem:[#allocation13_spill]]  ;;  %s2220_s17 = smov %s1668_s18 }
 0x301   : > { %s2221_s18 = smov %s1672_s19  ;;  %30 = sbr.rel (!%p28_p4) target bundleno = 18 (0x12), region = 136 }
 0x304   : > { %s2222_s19 = smov %s2217_s29 }
 0x306   :  { %1209 = vsyncpa [#allocation3], 1 }
 0x307   :  { %1211 = vsyncpa [#allocation3 + $0x1], 1 }
 0x308   :  { %1212 = vsyncpa [#allocation5], 1 }
 0x309   :  { %1214 = vsyncpa [#allocation5 + $0x1], 1 }
 0x30a   :  { %1215 = vsyncpa [#allocation8], 1 }
 0x30b   :  { %1217 = vsyncpa [#allocation8 + $0x1], 1 }

</bundles_post_ra>
